<compile_context>
chip_gen: v7x
topology: tpu7x:2x2x1
jax: 0.10.0
libtpu: 0.0.40
codegen_flags: <defaults>
</compile_context>

<pallas_src>
import jax
import jax.numpy as jnp
from jax.experimental import pallas as pl
from jax.experimental.pallas import tpu as pltpu


def _mul_kernel(x_ref, a_ref, o_ref):
    # x_ref: (TR, 384) block, a_ref: (1, 384) block. Broadcast multiply on VPU.
    o_ref[...] = x_ref[...] * a_ref[...]


def _ceil_div(a: int, b: int) -> int:
    return -(-a // b)


def my_module_forward(x: jax.Array, A: jax.Array) -> jax.Array:
    """Computes x * A with torch broadcast semantics (A has shape (1, 3))."""
    assert A.shape == (1, 3)

    out_shape = jnp.broadcast_shapes(x.shape, A.shape)
    dtype = jnp.result_type(x.dtype, A.dtype)
    xb = jnp.broadcast_to(x, out_shape).astype(dtype)
    Ab = A.astype(dtype)

    # Flatten all leading dims -> (R, 3).
    R = 1
    for d in out_shape[:-1]:
        R *= d
    x2d = xb.reshape(R, 3)

    LANES = 128            # rows folded into one lane-dense output row
    WIDTH = 3 * LANES      # 384: multiple of 128 -> unmasked, lane-dense stores
    TR_TARGET = 2048       # ~3 MiB per (TR, 384) f32 buffer; ~12 MiB pipelined

    # Fold rows into the lane-dense slab (contiguous reshape -> no data motion).
    r2 = _ceil_div(R, LANES)                 # wide rows of the lane-dense slab

    if r2 <= TR_TARGET:
        # Single grid step; block shape equals the full array dims, so no
        # (8,128)-divisibility requirement and no extra padding beyond the fold.
        tr = r2
        r2_pad = r2
    else:
        # Balance rows across grid steps and round the block to 8 sublanes so
        # the (8,128) tiling constraint holds with minimal padding waste.
        n_blocks = _ceil_div(r2, TR_TARGET)
        tr = _ceil_div(_ceil_div(r2, n_blocks), 8) * 8
        r2_pad = n_blocks * tr

    r_pad = r2_pad * LANES                   # padded flat-row count
    if r_pad != R:
        x2d = jnp.pad(x2d, ((0, r_pad - R), (0, 0)))

    x_wide = x2d.reshape(r2_pad, WIDTH)      # lane-dense slab
    a_wide = jnp.tile(Ab, (1, LANES))        # (1, 384): A repeated per triple

    grid = (r2_pad // tr,)

    out = pl.pallas_call(
        _mul_kernel,
        out_shape=jax.ShapeDtypeStruct((r2_pad, WIDTH), dtype),
        grid=grid,
        in_specs=[
            pl.BlockSpec((tr, WIDTH), lambda i: (i, 0)),
            pl.BlockSpec((1, WIDTH), lambda i: (0, 0)),
        ],
        out_specs=pl.BlockSpec((tr, WIDTH), lambda i: (i, 0)),
        compiler_params=pltpu.CompilerParams(
            dimension_semantics=("parallel",),
        ),
    )(x_wide, a_wide)

    out = out.reshape(r_pad, 3)[:R]
    return out.reshape(out_shape)


if __name__ == "__main__":
    key = jax.random.PRNGKey(0)
    kx, ka = jax.random.split(key)

    # Deterministic "parameter" A of shape (1, 3) (torch.empty is
    # uninitialized, so pick deterministic values in-script).
    A = jax.random.normal(ka, (1, 3), dtype=jnp.float32)

    # Small example input consistent with the forward (last dim 3).
    x = jax.random.normal(kx, (16, 3), dtype=jnp.float32)

    out = my_module_forward(x, A)
    out = jax.block_until_ready(out)

    # Sanity check against plain JAX broadcast multiply.
    ref = x * A
    assert out.shape == ref.shape
    assert jnp.allclose(out, ref, atol=1e-6, rtol=1e-6)

    print("KERNEL_OK")
</pallas_src>

<mosaic_0001>
module attributes {stable_mosaic.version = 11 : i64} {
  func.func @_mul_kernel(%arg0: i32, %arg1: memref<1x384xf32, #tpu.memory_space<vmem>>, %arg2: memref<1x384xf32, #tpu.memory_space<vmem>>, %arg3: memref<1x384xf32, #tpu.memory_space<vmem>>) attributes {dimension_semantics = [#tpu.dimension_semantics<parallel>], iteration_bounds = array<i64: 1>, scalar_prefetch = 0 : i64, scratch_operands = 0 : i64, tpu.core_type = #tpu.core_type<tc>, window_params = [{transform_indices = @transform_0, window_bounds = array<i64: 1, 384>}, {pipeline_mode = #tpu.pipeline_mode<synchronous>, transform_indices = @transform_1, window_bounds = array<i64: 1, 384>}, {transform_indices = @transform_2, window_bounds = array<i64: 1, 384>}]} {
    %c0 = arith.constant 0 : index
    %c0_0 = arith.constant 0 : index
    %0 = vector.load %arg1[%c0, %c0_0] : memref<1x384xf32, #tpu.memory_space<vmem>>, vector<1x384xf32>
    %c0_1 = arith.constant 0 : index
    %c0_2 = arith.constant 0 : index
    %1 = vector.load %arg2[%c0_1, %c0_2] : memref<1x384xf32, #tpu.memory_space<vmem>>, vector<1x384xf32>
    %2 = arith.mulf %0, %1 : vector<1x384xf32>
    %c0_3 = arith.constant 0 : index
    %c0_4 = arith.constant 0 : index
    %3 = vector.load %arg3[%c0_3, %c0_4] : memref<1x384xf32, #tpu.memory_space<vmem>>, vector<1x384xf32>
    tpu.vector_store %arg3[%c0_3, %c0_4], %2 {strides = array<i32>} : memref<1x384xf32, #tpu.memory_space<vmem>>, vector<1x384xf32>,
    return
  }
  func.func @transform_0(%arg0: i32) -> (i32, i32) {
    %c0_i32 = arith.constant 0 : i32
    %c0_i32_0 = arith.constant 0 : i32
    return %arg0, %c0_i32 : i32, i32
  }
  func.func @transform_1(%arg0: i32) -> (i32, i32) {
    %c0_i32 = arith.constant 0 : i32
    %c0_i32_0 = arith.constant 0 : i32
    %c0_i32_1 = arith.constant 0 : i32
    return %c0_i32, %c0_i32_0 : i32, i32
  }
  func.func @transform_2(%arg0: i32) -> (i32, i32) {
    %c0_i32 = arith.constant 0 : i32
    %c0_i32_0 = arith.constant 0 : i32
    return %arg0, %c0_i32 : i32, i32
  }
}

</mosaic_0001>

<bundles_post_ra>
// kernel: tpu_custom_call.1
= control target key start
LH: loop header
LB: loop body
LE: loop exit
PB: predicated region body
PF: predicated region fallthrough
CT: control target
= control target key end

     0   :  { %7 = vsyncpa [#allocation3], 0  ;;  %s141_s0 = inlined_call_operand.hbm [shape: f32[1,384], index: 0, kind: input, shape index: {}]   ;;  %s142_s1 = inlined_call_operand.vmem [shape: f32[1,384], index: 1, kind: input, shape index: {}]   ;;  %s143_s2 = inlined_call_operand.hbm [shape: f32[1,384], index: 2, kind: output, shape index: {}]  }
   0x1   :  { %8 = vsyncpa [#allocation4], 0  ;;  %s97_s9 = smov [#allocation2]   ;;  %s49_s13 = scalar_lea.hbm %s141_s0, 48 }
   0x2   :  { %s15_s10 = sshll.u32 %s97_s9, 4  ;;  %p50_p0 = scmp.ne.s32.totalorder %s141_s0, %s49_s13  ;;  %s16_s10 = int_to_ptr.vmem [resolvable:$true] %s15_s10 }
   0x3   :  { %p53_p1 = scmp.lt.u32.totalorder %s49_s13, %s141_s0 }
   0x5   :  { %p55_p2 = pnand %p53_p1, %p50_p0 }
   0x7   :  { %58 = shalt.err (!%p55_p2)
}
   0x8   :  { %s59_s18 = scalar_lea.vmem %s16_s10, 48  ;;  %s63_s19 = scalar_lea.vmem %s16_s10, 64 }
   0x9   :  { %p60_p3 = scmp.ne.s32.totalorder %s16_s10, %s59_s18  ;;  %p64_p4 = scmp.lt.s32.totalorder %s16_s10, %s16_s10 }
   0xa   :  { %p65_p5 = scmp.lt.s32.totalorder %s63_s19, %s59_s18 }
   0xc   :  { %p66_p6 = por %p65_p5, %p64_p4 }
   0xe   :  { %p67_p7 = pnand %p66_p6, %p60_p3 }
  0x10   :  { %70 = shalt.err (!%p67_p7)
}
  0x11   :  { %18 = dma.hbm_to_vmem [thread:$0]  %s141_s0, 48, %s16_s10, [#allocation3]  }
  0x12   :  { %93 = dma.done.wait [#allocation3], 48  }
  0x13   :  { %94 = vsyncadd [#allocation3], 4294967248  ;;  %v27_v0 = vlaneseq  ;;  %s98_s22 = smov [#allocation5]   ;;  %v24_v1 = vld [vmem:[#allocation2] sm:$0x7] }
  0x14   :  { %s38_s23 = sshll.u32 %s98_s22, 4  ;;  %v25_v2 = vld [vmem:[%s142_s1] sm:$0x7]  ;;  %s39_s23 = int_to_ptr.vmem [resolvable:$true] %s38_s23 }
  0x15   :  { %vm29_vm0 = vcmp.lt.s32.totalorder %v27_v0, 384  ;;  %v26_v3 = vmul.f32 %v25_v2, %v24_v1  ;;  %s71_s26 = scalar_lea.vmem %s39_s23, 48  ;;  %s75_s27 = scalar_lea.vmem %s39_s23, 64 }
  0x16   :  { %p72_p8 = scmp.ne.s32.totalorder %s39_s23, %s71_s26  ;;  %p76_p9 = scmp.lt.s32.totalorder %s39_s23, %s39_s23 }
  0x17   :  { %31 = vst.msk [vmem:[#allocation5] sm:$0x7] %vm29_vm0, %v26_v3  ;;  %p77_p10 = scmp.lt.s32.totalorder %s75_s27, %s71_s26 }
  0x19   :  { %p78_p11 = por %p77_p10, %p76_p9 }
  0x1b   :  { %p79_p12 = pnand %p78_p11, %p72_p8 }
  0x1d   :  { %82 = shalt.err (!%p79_p12)
}
  0x1e   :  { %s83_s29 = scalar_lea.hbm %s143_s2, 48 }
  0x1f   :  { %p84_p13 = scmp.ne.s32.totalorder %s143_s2, %s83_s29  ;;  %p87_p0 = scmp.lt.u32.totalorder %s83_s29, %s143_s2 }
  0x21   :  { %p89_p1 = pnand %p87_p0, %p84_p13 }
  0x23   :  { %92 = shalt.err (!%p89_p1)
}
  0x24   :  { %41 = dma.vmem_to_hbm [thread:$0]  %s39_s23, 48, %s143_s2, [#allocation4]  }
  0x25   :  { %95 = dma.done.wait [#allocation4], 48  }
  0x26   :  { %96 = vsyncadd [#allocation4], 4294967248 }
  0x27   :  { %45 = vsyncpa [#allocation3], 1 }
  0x28   :  { %46 = vsyncpa [#allocation4], 1 }

</bundles_post_ra>
